<compile_context>
chip_gen: v7x
topology: tpu7x:2x2x1
jax: 0.10.0
libtpu: 0.0.40
codegen_flags: <defaults>
</compile_context>

<pallas_src>
import jax
import jax.numpy as jnp
from jax.experimental import pallas as pl
from jax.experimental.pallas import tpu as pltpu

_LANE = 128
_SUBLANE = 8
_TARGET_BLOCK_BYTES = 1 << 20  # ~1 MiB x-block: ~85% of HBM roofline per tile sweep.


def _consistent_dropout_kernel(x_ref, m_ref, o_ref):
    # x_ref: (TB, TF)   m_ref: (1, TF)   o_ref: (TB, TF)
    # Shared mask row broadcast across the batch (sublane) axis; dtype-native
    # multiply (no f32 round-trip -> half the vreg pressure for bf16 inputs).
    o_ref[...] = x_ref[...] * m_ref[...]


def _pick_tiles(B, F, itemsize):
    """Pick (tb, tf): x block ~1 MiB, lane-dense, (8,128)-legal block shape."""
    f_rounded = ((F + _LANE - 1) // _LANE) * _LANE
    if B * _LANE * itemsize <= _TARGET_BLOCK_BYTES:
        # Full batch per block (block dim == array dim -> always legal).
        tb = B
        tf = (_TARGET_BLOCK_BYTES // max(1, B * itemsize)) // _LANE * _LANE
        tf = max(_LANE, min(tf, f_rounded))
    else:
        # Very large batch: tile the batch axis too (multiple of 8 sublanes).
        tf = _LANE
        tb = (_TARGET_BLOCK_BYTES // (_LANE * itemsize)) // _SUBLANE * _SUBLANE
        tb = max(_SUBLANE, min(tb, B))
        if tb != B:
            tb = max(_SUBLANE, (tb // _SUBLANE) * _SUBLANE)
    return tb, tf


def consistent_dropout(x, *, p=0.5, seed=0, training=True):
    """JAX/Pallas equivalent of ConsistentDropout(p).forward(x) in training mode."""
    q = 1.0 - p
    if q == 1.0 or not training:
        return x

    B = x.shape[0]
    F = 1
    for d in x.shape[1:]:
        F *= d
    x2d = x.reshape(B, F)

    itemsize = jnp.dtype(x.dtype).itemsize
    tb, tf = _pick_tiles(B, F, itemsize)

    # Shared dropout mask: Bernoulli(q) / q, one row, identical for all batch
    # rows.  Cast to x's dtype so the kernel multiply stays dtype-native.
    key = jax.random.PRNGKey(seed)
    keep = jax.random.bernoulli(key, p=q, shape=(1, F))
    mask = jnp.where(keep, jnp.float32(1.0 / q), jnp.float32(0.0)).astype(x.dtype)

    grid = (pl.cdiv(B, tb), pl.cdiv(F, tf))
    out2d = pl.pallas_call(
        _consistent_dropout_kernel,
        out_shape=jax.ShapeDtypeStruct((B, F), x.dtype),
        grid=grid,
        in_specs=[
            pl.BlockSpec((tb, tf), lambda b, f: (b, f)),   # x tile
            pl.BlockSpec((1, tf), lambda b, f: (0, f)),    # shared mask row tile
        ],
        out_specs=pl.BlockSpec((tb, tf), lambda b, f: (b, f)),
        compiler_params=pltpu.CompilerParams(
            dimension_semantics=("parallel", "parallel"),
        ),
    )(x2d, mask)

    return out2d.reshape(x.shape)


if __name__ == "__main__":
    key = jax.random.PRNGKey(0)
    # Small NCHW conv-activation-like input: batch=2, channels=4, spatial=16x16.
    x = jax.random.normal(key, (2, 4, 16, 16), dtype=jnp.float32)

    out = consistent_dropout(x, p=0.5, seed=1234, training=True)
    out = jax.block_until_ready(out)

    # Sanity: mask must be identical across the batch dimension.
    z0 = (out[0] == 0.0)
    z1 = (out[1] == 0.0)
    assert bool(jnp.all(z0 == z1)), "mask not consistent across batch"

    # Non-dropped elements are scaled by 1/q = 2 (compare only where kept).
    kept = ~z0
    ok0 = jnp.allclose(jnp.where(kept, out[0], 0.0),
                       jnp.where(kept, 2.0 * x[0], 0.0), rtol=1e-6, atol=1e-6)
    ok1 = jnp.allclose(jnp.where(kept, out[1], 0.0),
                       jnp.where(kept, 2.0 * x[1], 0.0), rtol=1e-6, atol=1e-6)
    assert bool(ok0), "kept elements (batch 0) not scaled by 1/q"
    assert bool(ok1), "kept elements (batch 1) not scaled by 1/q"

    # Eval / p=0 passthrough.
    assert bool(jnp.all(consistent_dropout(x, p=0.5, training=False) == x))
    assert bool(jnp.all(consistent_dropout(x, p=0.0, training=True) == x))

    print("KERNEL_OK")
</pallas_src>

<mosaic_0001>
module attributes {stable_mosaic.version = 11 : i64} {
  func.func @_consistent_dropout_kernel(%arg0: i32, %arg1: i32, %arg2: memref<2x1024xf32, #tpu.memory_space<vmem>>, %arg3: memref<1x1024xf32, #tpu.memory_space<vmem>>, %arg4: memref<2x1024xf32, #tpu.memory_space<vmem>>) attributes {dimension_semantics = [#tpu.dimension_semantics<parallel>, #tpu.dimension_semantics<parallel>], iteration_bounds = array<i64: 1, 1>, scalar_prefetch = 0 : i64, scratch_operands = 0 : i64, tpu.core_type = #tpu.core_type<tc>, window_params = [{transform_indices = @transform_0, window_bounds = array<i64: 2, 1024>}, {transform_indices = @transform_1, window_bounds = array<i64: 1, 1024>}, {transform_indices = @transform_2, window_bounds = array<i64: 2, 1024>}]} {
    %c0 = arith.constant 0 : index
    %c0_0 = arith.constant 0 : index
    %0 = vector.load %arg2[%c0, %c0_0] : memref<2x1024xf32, #tpu.memory_space<vmem>>, vector<2x1024xf32>
    %c0_1 = arith.constant 0 : index
    %c0_2 = arith.constant 0 : index
    %1 = vector.load %arg3[%c0_1, %c0_2] : memref<1x1024xf32, #tpu.memory_space<vmem>>, vector<1x1024xf32>
    %2 = vector.broadcast %1 : vector<1x1024xf32> to vector<2x1024xf32>
    %3 = arith.mulf %0, %2 : vector<2x1024xf32>
    %c0_3 = arith.constant 0 : index
    %c0_4 = arith.constant 0 : index
    %4 = vector.load %arg4[%c0_3, %c0_4] : memref<2x1024xf32, #tpu.memory_space<vmem>>, vector<2x1024xf32>
    tpu.vector_store %arg4[%c0_3, %c0_4], %3 {strides = array<i32>} : memref<2x1024xf32, #tpu.memory_space<vmem>>, vector<2x1024xf32>,
    return
  }
  func.func @transform_0(%arg0: i32, %arg1: i32) -> (i32, i32) {
    %c0_i32 = arith.constant 0 : i32
    return %arg0, %arg1 : i32, i32
  }
  func.func @transform_1(%arg0: i32, %arg1: i32) -> (i32, i32) {
    %c0_i32 = arith.constant 0 : i32
    %c0_i32_0 = arith.constant 0 : i32
    return %c0_i32, %arg1 : i32, i32
  }
  func.func @transform_2(%arg0: i32, %arg1: i32) -> (i32, i32) {
    %c0_i32 = arith.constant 0 : i32
    return %arg0, %arg1 : i32, i32
  }
}

</mosaic_0001>

<bundles_post_ra>
// kernel: tpu_custom_call.1
= control target key start
LH: loop header
LB: loop body
LE: loop exit
PB: predicated region body
PF: predicated region fallthrough
CT: control target
= control target key end

     0   :  { %7 = vsyncpa [#allocation3], 0  ;;  %s259_s0 = inlined_call_operand.hbm [shape: f32[2,1024], index: 0, kind: input, shape index: {}]   ;;  %s260_s1 = inlined_call_operand.hbm [shape: f32[1,1024], index: 1, kind: input, shape index: {}]   ;;  %s261_s2 = inlined_call_operand.hbm [shape: f32[2,1024], index: 2, kind: output, shape index: {}]  }
   0x1   :  { %8 = vsyncpa [#allocation6], 0 }
   0x2   :  { %9 = vsyncpa [#allocation4], 0  ;;  %s204_s9 = smov [#allocation2]   ;;  %s205_s11 = smov [#allocation5]  }
   0x3   :  { %s16_s10 = sshll.u32 %s204_s9, 4  ;;  %s26_s12 = sshll.u32 %s205_s11, 4  ;;  %s17_s10 = int_to_ptr.vmem [resolvable:$true] %s16_s10  ;;  %s27_s12 = int_to_ptr.vmem [resolvable:$true] %s26_s12 }
   0x4   :  { %s132_s15 = scalar_lea.hbm %s259_s0, 256 }
   0x5   :  { %p133_p0 = scmp.ne.s32.totalorder %s259_s0, %s132_s15  ;;  %p136_p1 = scmp.lt.u32.totalorder %s132_s15, %s259_s0 }
   0x7   :  { %p138_p2 = pnand %p136_p1, %p133_p0 }
   0x9   :  { %141 = shalt.err (!%p138_p2)
}
   0xa   :  { %s142_s20 = scalar_lea.vmem %s17_s10, 256  ;;  %p147_p4 = scmp.lt.s32.totalorder %s17_s10, %s17_s10 }
   0xb   :  { %p143_p3 = scmp.ne.s32.totalorder %s17_s10, %s142_s20  ;;  %p148_p5 = scmp.lt.s32.totalorder %s142_s20, %s142_s20 }
   0xd   :  { %p149_p6 = por %p148_p5, %p147_p4 }
   0xf   :  { %p150_p7 = pnand %p149_p6, %p143_p3 }
  0x11   :  { %153 = shalt.err (!%p150_p7)
}
  0x12   :  { %19 = dma.hbm_to_vmem [thread:$0]  %s259_s0, 256, %s17_s10, [#allocation3]  }
  0x13   :  { %s154_s25 = scalar_lea.hbm %s260_s1, 128 }
  0x14   :  { %p155_p8 = scmp.ne.s32.totalorder %s260_s1, %s154_s25  ;;  %p158_p9 = scmp.lt.u32.totalorder %s154_s25, %s260_s1 }
  0x16   :  { %p160_p10 = pnand %p158_p9, %p155_p8 }
  0x18   :  { %163 = shalt.err (!%p160_p10)
}
  0x19   :  { %s164_s30 = scalar_lea.vmem %s27_s12, 128  ;;  %p169_p12 = scmp.lt.s32.totalorder %s27_s12, %s27_s12 }
  0x1a   :  { %p165_p11 = scmp.ne.s32.totalorder %s27_s12, %s164_s30  ;;  %p170_p13 = scmp.lt.s32.totalorder %s164_s30, %s164_s30 }
  0x1c   :  { %p171_p0 = por %p170_p13, %p169_p12 }
  0x1e   :  { %p172_p1 = pnand %p171_p0, %p165_p11 }
  0x20   :  { %175 = shalt.err (!%p172_p1)
}
  0x21   :  { %29 = dma.hbm_to_vmem [thread:$0]  %s260_s1, 128, %s27_s12, [#allocation6]  }
  0x22   :  { %198 = dma.done.wait [#allocation3], 256  }
  0x23   :  { %199 = vsyncadd [#allocation3], 4294967040 }
  0x24   :  { %200 = dma.done.wait [#allocation6], 128  }
  0x25   :  { %201 = vsyncadd [#allocation6], 4294967168  ;;  %v40_v0 = vlaneseq  ;;  %v206_v1 = vmov 1983009808   ;;  %v38_v13 = vld [vmem:[#allocation5] sm:$0xff]  ;;  %v36_v29 = vld [vmem:[#allocation2] sm:$0xff] }
  0x26   :  { %v75_v2 = vunpack.c.l.s4 %v206_v1  ;;  %v37_v33 = vld [vmem:[#allocation2 + $0x8] sm:$0xff]  ;;  %s207_s1 = smov [#allocation7]  }
  0x27   :  { %v41_v3 = vshrl.u32 %v40_v0, 7  ;;  %s118_s4 = sshll.u32 %s207_s1, 4  ;;  %s119_s4 = int_to_ptr.vmem [resolvable:$true] %s118_s4 }
  0x28   :  { %v76_v4 = vunpack.c.0.s8 %v75_v2  ;;  %s176_s5 = scalar_lea.vmem %s119_s4, 256  ;;  %p181_p3 = scmp.lt.s32.totalorder %s119_s4, %s119_s4 }
  0x29   :  { %v42_v5 = vsub.s32 0, %v41_v3  ;;  %v46_v6 = vsub.s32 1, %v41_v3  ;;  %v50_v7 = vsub.s32 2, %v41_v3  ;;  %v54_v8 = vsub.s32 3, %v41_v3  ;;  %p177_p2 = scmp.ne.s32.totalorder %s119_s4, %s176_s5  ;;  %p182_p4 = scmp.lt.s32.totalorder %s176_s5, %s176_s5 }
  0x2a   :  { %v58_v9 = vsub.s32 4, %v41_v3  ;;  %v62_v10 = vsub.s32 5, %v41_v3  ;;  %v66_v11 = vsub.s32 6, %v41_v3  ;;  %v70_v12 = vsub.s32 7, %v41_v3 }
  0x2b   :  { %v79_v14 = vsub.s32 %v76_v4, %v41_v3  ;;  %v43_v15 = vrot.slane %v38_v13, %v42_v5  ;;  %v47_v16 = vrot.slane %v38_v13, %v46_v6  ;;  %v51_v17 = vrot.slane %v38_v13, %v50_v7  ;;  %p183_p5 = por %p182_p4, %p181_p3 }
  0x2c   :  { %v55_v18 = vrot.slane %v38_v13, %v54_v8  ;;  %v59_v19 = vrot.slane %v38_v13, %v58_v9  ;;  %v63_v20 = vrot.slane %v38_v13, %v62_v10  ;;  %v67_v21 = vrot.slane %v38_v13, %v66_v11 }
  0x2d   :  { %v71_v22 = vrot.slane %v38_v13, %v70_v12  ;;  %v72_v23 = vcombine.low %v43_v15, %v47_v16  ;;  %p184_p6 = pnand %p183_p5, %p177_p2 }
  0x2e   :  { %v73_v24 = vcombine.low %v51_v17, %v55_v18  ;;  %v89_v25 = vcombine.low %v59_v19, %v63_v20 }
  0x2f   :  { %v90_v26 = vcombine.low %v67_v21, %v71_v22  ;;  %v80_v27 = vrot.slane %v72_v23, %v79_v14 }
  0x30   :  { %v87_v28 = vrot.slane %v73_v24, %v79_v14  ;;  %v97_v30 = vrot.slane %v89_v25, %v79_v14 }
  0x31   :  { %v104_v31 = vrot.slane %v90_v26, %v79_v14 }
  0x32   :  { %v88_v32 = vcombine.low %v80_v27, %v87_v28 }
  0x33   :  { %v105_v34 = vcombine.low %v97_v30, %v104_v31 }
  0x34   :  { %v108_v35 = vmul.f32 %v88_v32, %v36_v29 }
  0x35   :  { %v109_v36 = vmul.f32 %v105_v34, %v37_v33 }
  0x36   :  { %110 = vst [vmem:[#allocation7] sm:$0xff] %v108_v35 }
  0x37   :  { %111 = vst [vmem:[#allocation7 + $0x8] sm:$0xff] %v109_v36 }
  0x38   :  { %187 = shalt.err (!%p184_p6)
}
  0x39   :  { %s188_s8 = scalar_lea.hbm %s261_s2, 256 }
  0x3a   :  { %p189_p7 = scmp.ne.s32.totalorder %s261_s2, %s188_s8  ;;  %p192_p8 = scmp.lt.u32.totalorder %s188_s8, %s261_s2 }
  0x3c   :  { %p194_p9 = pnand %p192_p8, %p189_p7 }
  0x3e   :  { %197 = shalt.err (!%p194_p9)
}
  0x3f   :  { %121 = dma.vmem_to_hbm [thread:$0]  %s119_s4, 256, %s261_s2, [#allocation4]  }
  0x40   :  { %202 = dma.done.wait [#allocation4], 256  }
  0x41   :  { %203 = vsyncadd [#allocation4], 4294967040 }
  0x42   :  { %125 = vsyncpa [#allocation3], 1 }
  0x43   :  { %126 = vsyncpa [#allocation6], 1 }
  0x44   :  { %127 = vsyncpa [#allocation4], 1 }

</bundles_post_ra>
